<compile_context>
chip_gen: v7x
topology: tpu7x:2x2x1
jax: 0.10.0
libtpu: 0.0.40
codegen_flags: <defaults>
</compile_context>

<pallas_src>
import functools

import jax
import jax.numpy as jnp
from jax.experimental import pallas as pl
from jax.experimental.pallas import tpu as pltpu


def _round_up(x, m):
    return (x + m - 1) // m * m


def _cdiv(a, b):
    return -(-a // b)


def actor_kernel(x_ref, w1_ref, w2_ref, wht_ref, b12_ref, bh_ref, out_ref, *, nr_actions):
    """One batch tile of the full ActorNet forward.

    x_ref   : [TB, F]   input tile (batch rows x features)
    w1_ref  : [F, H]    layer-1 weight (in x out), resident
    w2_ref  : [H, H]    layer-2 weight, resident
    wht_ref : [2A, H]   fused, transposed head weight: rows [0,A)=Wl^T, [A,2A)=Ws^T
    b12_ref : [2, H]    row 0 = b1, row 1 = b2
    bh_ref  : [2A, 1]   fused head bias as a column vector
    out_ref : [2A, TB]  transposed head output: rows [0,A)=tanh head, [A,2A)=softplus head
    """
    x = x_ref[...]
    b1 = b12_ref[0:1, :]
    b2 = b12_ref[1:2, :]

    # policy_base_net: Linear -> ReLU -> Linear -> ReLU  (row-major, MXU).
    h1 = jnp.maximum(jnp.dot(x, w1_ref[...], preferred_element_type=jnp.float32) + b1, 0.0)
    h2 = jnp.maximum(jnp.dot(h1, w2_ref[...], preferred_element_type=jnp.float32) + b2, 0.0)

    # Fused action heads, computed transposed: y[j, t] = sum_h wht[j, h] * h2[t, h].
    # [2A, TB] is lane-dense along the batch, so the transcendentals below touch
    # ~16x fewer vregs than a [TB, 2A] layout and the store is an unmasked vst.
    y = jax.lax.dot_general(
        wht_ref[...], h2, (((1,), (1,)), ((), ())),
        preferred_element_type=jnp.float32,
    ) + bh_ref[...]

    # Per-row activation select: rows [0, A) -> tanh, rows [A, 2A) -> softplus.
    row = jax.lax.broadcasted_iota(jnp.int32, (bh_ref.shape[0], 1), 0)   # single-vreg constant
    tanh_y = jnp.tanh(y)                                                 # loc head
    softplus_y = jnp.maximum(y, 0.0) + jnp.log1p(jnp.exp(-jnp.abs(y)))   # scale head (stable)
    out_ref[...] = jnp.where(row < nr_actions, tanh_y, softplus_y)


def pack_params(params):
    """Fuse/transpose head weights and pack biases into small resident buffers."""
    w1, w2 = params["w1"], params["w2"]
    wl, ws = params["wl"], params["ws"]
    A = wl.shape[1]

    wht = jnp.concatenate([wl.T, ws.T], axis=0).astype(jnp.float32)          # [2A, H]
    b12 = jnp.concatenate([params["b1"], params["b2"]], axis=0).astype(jnp.float32)  # [2, H]
    bh = jnp.concatenate(
        [params["bl"].reshape(-1), params["bs"].reshape(-1)]
    ).astype(jnp.float32)[:, None]                                           # [2A, 1]
    return w1.astype(jnp.float32), w2.astype(jnp.float32), wht, b12, bh, A


def _choose_tiling(batch, tb_target):
    """Pick (padded batch, batch tile, grid size).

    - Batch tile is a multiple of 128 so the transposed [2A, TB] output block is
      lane-dense (unmasked stores) and the x block satisfies the (8,128) rule.
    - Batch is padded only up to the chosen tile grid (waste <~ 128*grid rows,
      not up to a full tb_target like round_up(B, tb_target) would).
    - Grid is made even when >1 so v7x's two TensorCores stay balanced.
    """
    bp0 = _round_up(max(batch, 1), 128)
    n = max(1, _cdiv(bp0, max(128, _round_up(tb_target, 128))))
    if n > 1 and n % 2 == 1:
        n += 1
    tb = _round_up(_cdiv(bp0, n), 128)
    bp = n * tb
    return bp, tb, n


def actor_net_forward(x, params, *, tb=4096):
    """x: [B, F] float32. params: dict of weights (in,out) and biases (1,out)."""
    B, F = x.shape
    w1, w2, wht, b12, bh, A = pack_params(params)
    H = w1.shape[1]

    Bp, tile_b, n_tiles = _choose_tiling(B, tb)
    if Bp != B:
        x = jnp.pad(x, ((0, Bp - B), (0, 0)))

    kernel = functools.partial(actor_kernel, nr_actions=A)

    out = pl.pallas_call(
        kernel,
        out_shape=jax.ShapeDtypeStruct((2 * A, Bp), jnp.float32),
        grid=(n_tiles,),
        in_specs=[
            pl.BlockSpec((tile_b, F), lambda i: (i, 0)),   # x: tiled over batch
            pl.BlockSpec((F, H), lambda i: (0, 0)),        # W1: resident
            pl.BlockSpec((H, H), lambda i: (0, 0)),        # W2: resident
            pl.BlockSpec((2 * A, H), lambda i: (0, 0)),    # fused head weight (transposed)
            pl.BlockSpec((2, H), lambda i: (0, 0)),        # hidden-layer biases
            pl.BlockSpec((2 * A, 1), lambda i: (0, 0)),    # head bias column
        ],
        out_specs=pl.BlockSpec((2 * A, tile_b), lambda i: (0, i)),
        compiler_params=pltpu.CompilerParams(
            dimension_semantics=("parallel",),
        ),
    )(x, w1, w2, wht, b12, bh)

    # Transposed, fused output -> [B, A] locs / scales (tiny XLA copies).
    locs = out[:A, :B].T
    scales = out[A:2 * A, :B].T
    return locs, scales


def init_params(key, nr_input_features, nr_hidden_units, nr_actions):
    """Deterministic synthetic init (uniform, roughly PyTorch Linear scale)."""
    def linear(k, fan_in, fan_out):
        kw, kb = jax.random.split(k)
        bound = 1.0 / jnp.sqrt(fan_in)
        w = jax.random.uniform(kw, (fan_in, fan_out), jnp.float32, -bound, bound)
        b = jax.random.uniform(kb, (1, fan_out), jnp.float32, -bound, bound)
        return w, b

    k1, k2, k3, k4 = jax.random.split(key, 4)
    w1, b1 = linear(k1, nr_input_features, nr_hidden_units)
    w2, b2 = linear(k2, nr_hidden_units, nr_hidden_units)
    wl, bl = linear(k3, nr_hidden_units, nr_actions)
    ws, bs = linear(k4, nr_hidden_units, nr_actions)
    return dict(w1=w1, b1=b1, w2=w2, b2=b2, wl=wl, bl=bl, ws=ws, bs=bs)


def actor_net_reference(x, p):
    """Pure-JAX reference of the PyTorch forward for correctness checking."""
    h1 = jax.nn.relu(x @ p["w1"] + p["b1"])
    h2 = jax.nn.relu(h1 @ p["w2"] + p["b2"])
    locs = jnp.tanh(h2 @ p["wl"] + p["bl"])
    scales = jax.nn.softplus(h2 @ p["ws"] + p["bs"])
    return locs, scales


if __name__ == "__main__":
    # Small shapes consistent with the module's forward; batch=300 with tb=128
    # exercises batch padding plus a multi-step (even) grid.
    batch = 300
    nr_input_features = 32
    nr_hidden_units = 32
    nr_actions = 4

    key = jax.random.PRNGKey(0)
    kx, kp = jax.random.split(key)
    x = jax.random.normal(kx, (batch, nr_input_features), dtype=jnp.float32)
    params = init_params(kp, nr_input_features, nr_hidden_units, nr_actions)

    locs, scales = actor_net_forward(x, params, tb=128)
    jax.block_until_ready((locs, scales))

    ref_locs, ref_scales = actor_net_reference(x, params)
    assert locs.shape == (batch, nr_actions) and scales.shape == (batch, nr_actions)
    assert jnp.allclose(locs, ref_locs, atol=1e-5, rtol=1e-5)
    assert jnp.allclose(scales, ref_scales, atol=1e-5, rtol=1e-5)

    print("KERNEL_OK")
</pallas_src>

<mosaic_0001>
module attributes {stable_mosaic.version = 11 : i64} {
  func.func @actor_kernel(%arg0: i32, %arg1: memref<128x32xf32, #tpu.memory_space<vmem>>, %arg2: memref<32x32xf32, #tpu.memory_space<vmem>>, %arg3: memref<32x32xf32, #tpu.memory_space<vmem>>, %arg4: memref<8x32xf32, #tpu.memory_space<vmem>>, %arg5: memref<2x32xf32, #tpu.memory_space<vmem>>, %arg6: memref<8x1xf32, #tpu.memory_space<vmem>>, %arg7: memref<8x128xf32, #tpu.memory_space<vmem>>) attributes {dimension_semantics = [#tpu.dimension_semantics<parallel>], iteration_bounds = array<i64: 4>, scalar_prefetch = 0 : i64, scratch_operands = 0 : i64, tpu.core_type = #tpu.core_type<tc>, window_params = [{transform_indices = @transform_0, window_bounds = array<i64: 128, 32>}, {pipeline_mode = #tpu.pipeline_mode<synchronous>, transform_indices = @transform_1, window_bounds = array<i64: 32, 32>}, {pipeline_mode = #tpu.pipeline_mode<synchronous>, transform_indices = @transform_2, window_bounds = array<i64: 32, 32>}, {pipeline_mode = #tpu.pipeline_mode<synchronous>, transform_indices = @transform_3, window_bounds = array<i64: 8, 32>}, {pipeline_mode = #tpu.pipeline_mode<synchronous>, transform_indices = @transform_4, window_bounds = array<i64: 2, 32>}, {pipeline_mode = #tpu.pipeline_mode<synchronous>, transform_indices = @transform_5, window_bounds = array<i64: 8, 1>}, {transform_indices = @transform_6, window_bounds = array<i64: 8, 128>}]} {
    %c0 = arith.constant 0 : index
    %c0_0 = arith.constant 0 : index
    %0 = vector.load %arg1[%c0, %c0_0] : memref<128x32xf32, #tpu.memory_space<vmem>>, vector<128x32xf32>
    %c0_1 = arith.constant 0 : index
    %c0_2 = arith.constant 0 : index
    %1 = vector.load %arg5[%c0_1, %c0_2] : memref<2x32xf32, #tpu.memory_space<vmem>>, vector<1x32xf32>
    %c1 = arith.constant 1 : index
    %c0_3 = arith.constant 0 : index
    %2 = vector.load %arg5[%c1, %c0_3] : memref<2x32xf32, #tpu.memory_space<vmem>>, vector<1x32xf32>
    %c0_4 = arith.constant 0 : index
    %c0_5 = arith.constant 0 : index
    %3 = vector.load %arg2[%c0_4, %c0_5] : memref<32x32xf32, #tpu.memory_space<vmem>>, vector<32x32xf32>
    %cst = arith.constant dense<0.000000e+00> : vector<128x32xf32>
    %4 = tpu.matmul %0, %3, %cst {dimension_numbers = #tpu.dot_dimension_numbers<[1], [0], [0], [1], [0, 0, 1, 1], [], []>} : vector<128x32xf32>, vector<32x32xf32>, vector<128x32xf32> -> vector<128x32xf32>
    %5 = vector.broadcast %1 : vector<1x32xf32> to vector<128x32xf32>
    %6 = arith.addf %4, %5 : vector<128x32xf32>
    %cst_6 = arith.constant 0.000000e+00 : f32
    %7 = vector.broadcast %cst_6 : f32 to vector<128x32xf32>
    %8 = arith.maximumf %6, %7 : vector<128x32xf32>
    %c0_7 = arith.constant 0 : index
    %c0_8 = arith.constant 0 : index
    %9 = vector.load %arg3[%c0_7, %c0_8] : memref<32x32xf32, #tpu.memory_space<vmem>>, vector<32x32xf32>
    %cst_9 = arith.constant dense<0.000000e+00> : vector<128x32xf32>
    %10 = tpu.matmul %8, %9, %cst_9 {dimension_numbers = #tpu.dot_dimension_numbers<[1], [0], [0], [1], [0, 0, 1, 1], [], []>} : vector<128x32xf32>, vector<32x32xf32>, vector<128x32xf32> -> vector<128x32xf32>
    %11 = vector.broadcast %2 : vector<1x32xf32> to vector<128x32xf32>
    %12 = arith.addf %10, %11 : vector<128x32xf32>
    %cst_10 = arith.constant 0.000000e+00 : f32
    %13 = vector.broadcast %cst_10 : f32 to vector<128x32xf32>
    %14 = arith.maximumf %12, %13 : vector<128x32xf32>
    %c0_11 = arith.constant 0 : index
    %c0_12 = arith.constant 0 : index
    %15 = vector.load %arg4[%c0_11, %c0_12] : memref<8x32xf32, #tpu.memory_space<vmem>>, vector<8x32xf32>
    %cst_13 = arith.constant dense<0.000000e+00> : vector<8x128xf32>
    %16 = tpu.matmul %15, %14, %cst_13 {dimension_numbers = #tpu.dot_dimension_numbers<[1], [1], [0], [0], [0, 0, 1, 0], [], []>} : vector<8x32xf32>, vector<128x32xf32>, vector<8x128xf32> -> vector<8x128xf32>
    %c0_14 = arith.constant 0 : index
    %c0_15 = arith.constant 0 : index
    %17 = vector.load %arg6[%c0_14, %c0_15] : memref<8x1xf32, #tpu.memory_space<vmem>>, vector<8x1xf32>
    %18 = vector.broadcast %17 : vector<8x1xf32> to vector<8x128xf32>
    %19 = arith.addf %16, %18 : vector<8x128xf32>
    %20 = tpu.iota {dimensions = array<i32: 0>} : vector<8x1xi32>
    %21 = math.tanh %19 : vector<8x128xf32>
    %cst_16 = arith.constant 0.000000e+00 : f32
    %22 = vector.broadcast %cst_16 : f32 to vector<8x128xf32>
    %23 = arith.maximumf %19, %22 : vector<8x128xf32>
    %24 = math.absf %19 : vector<8x128xf32>
    %cst_17 = arith.constant 0.000000e+00 : f32
    %25 = vector.broadcast %cst_17 : f32 to vector<8x128xf32>
    %26 = arith.subf %25, %24 : vector<8x128xf32>
    %27 = math.exp %26 : vector<8x128xf32>
    %28 = math.log1p %27 : vector<8x128xf32>
    %29 = arith.addf %23, %28 : vector<8x128xf32>
    %c4_i32 = arith.constant 4 : i32
    %30 = vector.broadcast %c4_i32 : i32 to vector<8x1xi32>
    %31 = arith.cmpi slt, %20, %30 : vector<8x1xi32>
    %32 = vector.shape_cast %31 : vector<8x1xi1> to vector<8x1xi1>
    %33 = vector.broadcast %32 : vector<8x1xi1> to vector<8x128xi1>
    %34 = arith.select %33, %21, %29 : vector<8x128xi1>, vector<8x128xf32>
    %c0_18 = arith.constant 0 : index
    %c0_19 = arith.constant 0 : index
    %35 = vector.load %arg7[%c0_18, %c0_19] : memref<8x128xf32, #tpu.memory_space<vmem>>, vector<8x128xf32>
    tpu.vector_store %arg7[%c0_18, %c0_19], %34 {strides = array<i32>} : memref<8x128xf32, #tpu.memory_space<vmem>>, vector<8x128xf32>,
    return
  }
  func.func @transform_0(%arg0: i32) -> (i32, i32) {
    %c0_i32 = arith.constant 0 : i32
    %c0_i32_0 = arith.constant 0 : i32
    return %arg0, %c0_i32 : i32, i32
  }
  func.func @transform_1(%arg0: i32) -> (i32, i32) {
    %c0_i32 = arith.constant 0 : i32
    %c0_i32_0 = arith.constant 0 : i32
    %c0_i32_1 = arith.constant 0 : i32
    return %c0_i32, %c0_i32_0 : i32, i32
  }
  func.func @transform_2(%arg0: i32) -> (i32, i32) {
    %c0_i32 = arith.constant 0 : i32
    %c0_i32_0 = arith.constant 0 : i32
    %c0_i32_1 = arith.constant 0 : i32
    return %c0_i32, %c0_i32_0 : i32, i32
  }
  func.func @transform_3(%arg0: i32) -> (i32, i32) {
    %c0_i32 = arith.constant 0 : i32
    %c0_i32_0 = arith.constant 0 : i32
    %c0_i32_1 = arith.constant 0 : i32
    return %c0_i32, %c0_i32_0 : i32, i32
  }
  func.func @transform_4(%arg0: i32) -> (i32, i32) {
    %c0_i32 = arith.constant 0 : i32
    %c0_i32_0 = arith.constant 0 : i32
    %c0_i32_1 = arith.constant 0 : i32
    return %c0_i32, %c0_i32_0 : i32, i32
  }
  func.func @transform_5(%arg0: i32) -> (i32, i32) {
    %c0_i32 = arith.constant 0 : i32
    %c0_i32_0 = arith.constant 0 : i32
    %c0_i32_1 = arith.constant 0 : i32
    return %c0_i32, %c0_i32_0 : i32, i32
  }
  func.func @transform_6(%arg0: i32) -> (i32, i32) {
    %c0_i32 = arith.constant 0 : i32
    %c0_i32_0 = arith.constant 0 : i32
    return %c0_i32, %arg0 : i32, i32
  }
}

</mosaic_0001>

<bundles_post_ra>
// kernel: tpu_custom_call.1
= control target key start
LH: loop header
LB: loop body
LE: loop exit
PB: predicated region body
PF: predicated region fallthrough
CT: control target
= control target key end

     0   :  { %11 = vsyncpa [#allocation3], 0  ;;  %s1565_s0 = inlined_call_operand.vmem [shape: f32[512,32], index: 0, kind: input, shape index: {}]   ;;  %s1566_s1 = inlined_call_operand.vmem [shape: f32[32,32], index: 1, kind: input, shape index: {}]   ;;  %s1567_s2 = inlined_call_operand.vmem [shape: f32[32,32], index: 2, kind: input, shape index: {}]   ;;  %s1568_s3 = inlined_call_operand.vmem [shape: f32[8,32], index: 3, kind: input, shape index: {}]   ;;  %s1569_s4 = inlined_call_operand.vmem [shape: f32[2,32], index: 4, kind: input, shape index: {}]   ;;  %s1570_s5 = inlined_call_operand.vmem [shape: f32[8,1], index: 5, kind: input, shape index: {}]   ;;  %s1571_s6 = inlined_call_operand.hbm [shape: f32[8,512], index: 6, kind: output, shape index: {}]  }
   0x1   :  { %13 = vsyncpa [#allocation3 + $0x1], 0  ;;  %s1349_s21 = smov 0   ;;  %s1351_s22 = smov 0  }
   0x2   :  { %s1353_s23 = smov 0   ;;  %s1355_s24 = smov 0  }
   0x3 LB: > { %s1370_s25 = sadd.s32 4294967295, %s1307_s24   ;;  %s929_s26 = sadd.s32 4294967294, %s1307_s24   ;;  %s1307_s24 = sphi %s1355_s24, %s1579_s24   ;;  %s1303_s23 = sphi %s1353_s23, %s1578_s23   ;;  %s1299_s22 = sphi %s1351_s22, %s1577_s22   ;;  %s1295_s21 = sphi %s1349_s21, %s1576_s21  }
   0x4   : > { %s1374_s27 = sadd.s32 1, %s1307_s24   ;;  %s157_s28 = sadd.s32 1, %s1303_s23 }
   0x5   : > { %s154_s29 = ssub.s32 %s1307_s24, %s1374_s27  ;;  %p167_p0 = scmp.ne.s32.totalorder %s1303_s23, %s1299_s22 }
   0x6   : > { %p155_p1 = scmp.eq.s32.totalorder %s154_s29, 0  ;;  %p168_p2 = scmp.eq.s32.totalorder %s1370_s25, 3 }
   0x7   : > { %p173_p3 = scmp.ne.s32.totalorder %s1299_s22, %s1295_s21  ;;  %p174_p4 = scmp.eq.s32.totalorder %s929_s26, 3 }
   0x8   : > { %s1385_s30 = scalar_select %p155_p1, %s1303_s23, %s157_s28  }
   0x9   : > { %p1387_p5 = por %p168_p2, %p167_p0  ;;  %p1391_p6 = por %p174_p4, %p173_p3 }
   0xa   : > { %p932_p7 = scmp.ge.s32.totalorder %s1307_s24, 1  ;;  %p216_p8 = scmp.lt.s32.totalorder %s1307_s24, 5 }
   0xc   : > { %p217_p9 = pnand %p932_p7, %p216_p8 }
   0xd   : > { %v270_v0 = vld [vmem:[%s1566_s1] sm:$0xff] (!%p217_p9)  ;;  %v271_v1 = vld [vmem:[%s1566_s1 + $0x8] sm:$0xff] (!%p217_p9)  ;;  %v272_v2 = vld [vmem:[%s1566_s1 + $0x10] sm:$0xff] (!%p217_p9)  ;;  %s934_s15 = sshll.u32 (!%p217_p9), %s1370_s25, 4  ;;  %vm278_vm0 = vcmask (!%p217_p9), 261120   ;;  %vm1310_vm1 = vmmov (!%p217_p9), 0  }
   0xe   : > { %220 = sbr.rel (%p217_p9) target bundleno = 790 (0x316), region = 44  ;;  %v1147_v3 = vpack.c.bf16 (!%p217_p9), %v271_v1, %v270_v0  ;;  %v273_v4 = vld [vmem:[%s1566_s1 + $0x18] sm:$0xff] (!%p217_p9)  ;;  %p247_p10 = scmp.lt.s32.totalorder (!%p217_p9), %s934_s15, 63  ;;  %v488_v6 = vld [vmem:[%s1567_s2] sm:$0xff] (!%p217_p9)  ;;  %v489_v7 = vld [vmem:[%s1567_s2 + $0x8] sm:$0xff] (!%p217_p9) }
   0xf   : > { %v1151_v5 = vpack.c.bf16 (!%p217_p9), %v273_v4, %v272_v2  ;;  %v1155_v8 = vpack.c.bf16 (!%p217_p9), %v489_v7, %v488_v6  ;;  %v490_v9 = vld [vmem:[%s1567_s2 + $0x10] sm:$0xff] (!%p217_p9)  ;;  %v491_v10 = vld [vmem:[%s1567_s2 + $0x18] sm:$0xff] (!%p217_p9)  ;;  %v936_v28 = vld [vmem:[%s1569_s4] ss:$0 sm:$0xff] (!%p217_p9)  ;;  %s243_s29 = sand.u32 (!%p217_p9), 1, %s1299_s22   ;;  %s1313_s17 = smov (!%p217_p9), [#allocation2]  }
  0x10   : > { %1148 = vmatprep.subr.bf16.mxu1 (!%p217_p9), %v1147_v3  ;;  %v1159_v14 = vpack.c.bf16 (!%p217_p9), %v491_v10, %v490_v9  ;;  %vm1487_vm2 = vmpackc.low (!%p217_p9), %vm278_vm0, %vm278_vm0  ;;  %s933_s9 = sshll.u32 (!%p217_p9), %s243_s29, 3  ;;  %s857_s16 = scalar_lea.sflag (!%p217_p9), [#allocation3], %s243_s29 }
  0x11   : > { %1150 = vmatpush3.bf16.msra.mxu1 (!%p217_p9), %v1147_v3  ;;  %s245_s11 = scalar_lea.vmem (!%p217_p9), [#allocation2], %s933_s9  ;;  %s1249_s18 = sshll.u32 (!%p217_p9), %s1313_s17, 4  ;;  %s1250_s18 = int_to_ptr.vmem [resolvable:$false] %s1249_s18 }
  0x12   : > { %1152 = vmatprep.subr.bf16.mxu1 (!%p217_p9), %v1151_v5  ;;  %s870_s12 = sshll.u32 (!%p217_p9), %s245_s11, 4  ;;  %s1251_s19 = scalar_lea.vmem (!%p217_p9), %s1250_s18, 256  ;;  %s1525_s12 = int_to_ptr.vmem [resolvable:$true] %s870_s12 }
  0x13   : > { %p1252_p0 = scmp.lt.s32.totalorder (!%p217_p9), %s1525_s12, %s1250_s18 }
  0x15   : > { %s1581_s15 = smov (!%p247_p10, %s934_s15), 63  ;;  %1154 = vmatpush3.bf16.msra.mxu1 %v1151_v5 }
  0x16   : > { %s935_s28 = sshll.u32 %s1581_s15, 3  ;;  %1156 = vmatprep.subr.bf16.mxu1 %v1155_v8 }
  0x17   : > { %s1419_s10 = scalar_lea.vmem %s1565_s0, %s935_s28 }
  0x18   : > { %v252_v11 = vld [vmem:[%s1419_s10] sm:$0xff]  ;;  %v253_v12 = vld [vmem:[%s1419_s10 + $0x8] sm:$0xff]  ;;  %v254_v13 = vld [vmem:[%s1419_s10 + $0x10] sm:$0xff] }
  0x19   : > { %1056 = vmatprep.mubr.msk.f32.mxu1 %vm278_vm0, %v252_v11  ;;  %v255_v15 = vld [vmem:[%s1419_s10 + $0x18] sm:$0xff]  ;;  %v256_v16 = vld [vmem:[%s1419_s10 + $0x20] sm:$0xff]  ;;  %v257_v17 = vld [vmem:[%s1419_s10 + $0x28] sm:$0xff] }
  0x1a   : > { %1057 = vmatmul.mubr.msk.f32.vlgmr.msra.gmra.mrb[0].mxu1 %vm278_vm0, %v253_v12  ;;  %v258_v18 = vld [vmem:[%s1419_s10 + $0x30] sm:$0xff]  ;;  %v259_v19 = vld [vmem:[%s1419_s10 + $0x38] sm:$0xff]  ;;  %v260_v20 = vld [vmem:[%s1419_s10 + $0x40] sm:$0xff] }
  0x1b   : > { %1059 = vmatprep.mubr.msk.f32.mxu1 %vm278_vm0, %v254_v13  ;;  %1158 = vmatpush3.bf16.msra.mxu1 %v1155_v8  ;;  %v261_v21 = vld [vmem:[%s1419_s10 + $0x48] sm:$0xff]  ;;  %v262_v22 = vld [vmem:[%s1419_s10 + $0x50] sm:$0xff]  ;;  %v263_v23 = vld [vmem:[%s1419_s10 + $0x58] sm:$0xff]  ;;  %v1309_v13 = vmov 0.0|0.0  }
  0x1c   : > { %1160 = vmatprep.subr.bf16.mxu1 %v1159_v14  ;;  %v264_v24 = vld [vmem:[%s1419_s10 + $0x60] sm:$0xff]  ;;  %v265_v25 = vld [vmem:[%s1419_s10 + $0x68] sm:$0xff]  ;;  %v266_v26 = vld [vmem:[%s1419_s10 + $0x70] sm:$0xff]  ;;  %1163 = vmatprep.subr.bf16.mxu0 %v1309_v13 }
  0x1d   : > { %v267_v27 = vld [vmem:[%s1419_s10 + $0x78] sm:$0xff]  ;;  %s988_s10 = sshll.u32 %s1370_s25, 7  ;;  %s1245_s25 = scalar_lea.vmem %s1525_s12, 128 }
  0x1e   : > { %1060 = vmatmul.mubr.msk.f32.gmra.mrb[2].mxu1 %vm278_vm0, %v255_v15  ;;  %v706_v15 = vld [vmem:[%s1570_s5] sm:$0xff]  ;;  %s1523_s15 = scalar_lea.hbm %s1571_s6, %s988_s10  ;;  %p1246_p11 = scmp.ne.s32.totalorder %s1525_s12, %s1245_s25 }
  0x1f   : > { %1062 = vmatprep.mubr.msk.f32.mxu1 %vm278_vm0, %v256_v16  ;;  %1162 = vmatpush3.bf16.msra.mxu1 %v1159_v14  ;;  %v1311_v14 = vmov 0.0   ;;  %v1312_v16 = vmov 0   ;;  %p1253_p1 = scmp.lt.s32.totalorder %s1251_s19, %s1245_s25 }
  0x20   : > { %1144 = vmatprep.mubr.msk.f32.mxu0 %vm1310_vm1, %v1311_v14  ;;  %1238 = vset.pattern.permute.xlu0 %v1312_v16  ;;  %p1247_p12 = pnand %p1246_p11, %p1387_p5 }
  0x21   : > { %709 = vperm.xlu0 %1238, %v706_v15   ;;  %p1254_p2 = por %p1253_p1, %p1252_p0 }
  0x22   : > { %1063 = vmatmul.mubr.msk.f32.gmra.mrb[4].mxu1 %vm278_vm0, %v257_v17  ;;  %v953_v17 = vld [vmem:[%s1569_s4 + $0x1] ss:$0 sm:$0xff]  ;;  %p1248_p13 = pneg %p1247_p12 }
  0x23   : > { %1065 = vmatprep.mubr.msk.f32.mxu1 %vm278_vm0, %v258_v18 }
  0x24   : > { %p1255_p3 = pnand %p1254_p2, %p1248_p13 }
  0x26   : > { %1066 = vmatmul.mubr.msk.f32.gmra.mrb[6].mxu1 %vm278_vm0, %v259_v19 }
  0x27   : > { %1068 = vmatprep.mubr.msk.f32.mxu1 %vm278_vm0, %v260_v20 }
  0x2a   : > { %1069 = vmatmul.mubr.msk.f32.gmra.mrb[8].mxu1 %vm278_vm0, %v261_v21 }
  0x2b   : > { %1071 = vmatprep.mubr.msk.f32.mxu1 %vm278_vm0, %v262_v22 }
  0x2e   : > { %1072 = vmatmul.mubr.msk.f32.gmra.mrb[10].mxu1 %vm278_vm0, %v263_v23 }
  0x2f   : > { %1074 = vmatprep.mubr.msk.f32.mxu1 %vm278_vm0, %v264_v24 }
  0x32   : > { %1075 = vmatmul.mubr.msk.f32.gmra.mrb[12].mxu1 %vm278_vm0, %v265_v25 }
  0x33   : > { %1077 = vmatprep.mubr.msk.f32.mxu1 %vm278_vm0, %v266_v26 }
  0x36   : > { %1078 = vmatmul.mubr.msk.f32.gmra.mrb[14].mxu1 %vm278_vm0, %v267_v27 }
  0xed   : > { %v1058_v29 = vpop.f32.mrb[0].mxu1 }
  0xee   : > { %v399_v30 = vadd.f32 %v1058_v29, %v936_v28  ;;  %v393_v31 = vpop.f32.mrb[1].mxu1 }
  0xef   : > { %v394_v32 = vadd.f32 %v936_v28, %v393_v31 }
  0xf0   : > { %v473_v35 = vmax.f32 %v399_v30, 0.0 }
  0xf1   : > { %v472_v33 = vmax.f32 %v394_v32, 0.0  ;;  %v1061_v34 = vpop.f32.mrb[2].mxu1 }
  0xf2   : > { %v409_v36 = vadd.f32 %v1061_v34, %v936_v28  ;;  %v403_v37 = vpop.f32.mrb[3].mxu1 }
  0xf3   : > { %v404_v38 = vadd.f32 %v936_v28, %v403_v37  ;;  %1088 = vmatprep.mubr.msk.f32.mxu1 %vm278_vm0, %v472_v33 }
  0xf4   : > { %v475_v39 = vmax.f32 %v409_v36, 0.0  ;;  %1089 = vmatmul.mubr.msk.f32.vlgmr.msra.gmra.mrb[16].mxu1 %vm278_vm0, %v473_v35 }
  0xf5   : > { %v474_v40 = vmax.f32 %v404_v38, 0.0  ;;  %v1064_v41 = vpop.f32.mrb[4].mxu1 }
  0xf6   : > { %v419_v42 = vadd.f32 %v1064_v41, %v936_v28  ;;  %v413_v43 = vpop.f32.mrb[5].mxu1 }
  0xf7   : > { %1091 = vmatprep.mubr.msk.f32.mxu1 %vm278_vm0, %v474_v40  ;;  %v414_v44 = vadd.f32 %v936_v28, %v413_v43 }
  0xf8   : > { %1092 = vmatmul.mubr.msk.f32.gmra.mrb[18].mxu1 %vm278_vm0, %v475_v39  ;;  %v477_v45 = vmax.f32 %v419_v42, 0.0 }
  0xf9   : > { %v476_v46 = vmax.f32 %v414_v44, 0.0  ;;  %v1067_v47 = vpop.f32.mrb[6].mxu1 }
  0xfa   : > { %v429_v48 = vadd.f32 %v1067_v47, %v936_v28  ;;  %v423_v49 = vpop.f32.mrb[7].mxu1 }
  0xfb   : > { %1094 = vmatprep.mubr.msk.f32.mxu1 %vm278_vm0, %v476_v46  ;;  %v424_v50 = vadd.f32 %v936_v28, %v423_v49 }
  0xfc   : > { %1095 = vmatmul.mubr.msk.f32.gmra.mrb[20].mxu1 %vm278_vm0, %v477_v45  ;;  %v479_v51 = vmax.f32 %v429_v48, 0.0 }
  0xfd   : > { %v478_v52 = vmax.f32 %v424_v50, 0.0  ;;  %v1070_v53 = vpop.f32.mrb[8].mxu1 }
  0xfe   : > { %v439_v54 = vadd.f32 %v1070_v53, %v936_v28  ;;  %v433_v55 = vpop.f32.mrb[9].mxu1 }
  0xff   : > { %1097 = vmatprep.mubr.msk.f32.mxu1 %vm278_vm0, %v478_v52  ;;  %v434_v56 = vadd.f32 %v936_v28, %v433_v55 }
 0x100   : > { %1098 = vmatmul.mubr.msk.f32.gmra.mrb[22].mxu1 %vm278_vm0, %v479_v51  ;;  %v481_v57 = vmax.f32 %v439_v54, 0.0 }
 0x101   : > { %v480_v58 = vmax.f32 %v434_v56, 0.0  ;;  %v1073_v59 = vpop.f32.mrb[10].mxu1 }
 0x102   : > { %v449_v60 = vadd.f32 %v1073_v59, %v936_v28  ;;  %v443_v61 = vpop.f32.mrb[11].mxu1 }
 0x103   : > { %1100 = vmatprep.mubr.msk.f32.mxu1 %vm278_vm0, %v480_v58  ;;  %v444_v62 = vadd.f32 %v936_v28, %v443_v61 }
 0x104   : > { %1101 = vmatmul.mubr.msk.f32.gmra.mrb[24].mxu1 %vm278_vm0, %v481_v57  ;;  %v483_v63 = vmax.f32 %v449_v60, 0.0 }
 0x105   : > { %v482_v0 = vmax.f32 %v444_v62, 0.0  ;;  %v1076_v1 = vpop.f32.mrb[12].mxu1 }
 0x106   : > { %v459_v2 = vadd.f32 %v1076_v1, %v936_v28  ;;  %v453_v3 = vpop.f32.mrb[13].mxu1 }
 0x107   : > { %1103 = vmatprep.mubr.msk.f32.mxu1 %vm278_vm0, %v482_v0  ;;  %v454_v4 = vadd.f32 %v936_v28, %v453_v3 }
 0x108   : > { %1104 = vmatmul.mubr.msk.f32.gmra.mrb[26].mxu1 %vm278_vm0, %v483_v63  ;;  %v485_v5 = vmax.f32 %v459_v2, 0.0 }
 0x109   : > { %v484_v6 = vmax.f32 %v454_v4, 0.0  ;;  %v1079_v7 = vpop.f32.mrb[14].mxu1 }
 0x10a   : > { %v469_v8 = vadd.f32 %v1079_v7, %v936_v28  ;;  %v463_v9 = vpop.f32.mrb[15].mxu1 }
 0x10b   : > { %1106 = vmatprep.mubr.msk.f32.mxu1 %vm278_vm0, %v484_v6  ;;  %v464_v10 = vadd.f32 %v936_v28, %v463_v9 }
 0x10c   : > { %1107 = vmatmul.mubr.msk.f32.gmra.mrb[28].mxu1 %vm278_vm0, %v485_v5  ;;  %v487_v11 = vmax.f32 %v469_v8, 0.0 }
 0x10d   : > { %v486_v12 = vmax.f32 %v464_v10, 0.0 }
 0x10f   : > { %1109 = vmatprep.mubr.msk.f32.mxu1 %vm278_vm0, %v486_v12  ;;  %v710_v12 = vpop.permute.xlu0 %709 }
 0x110   : > { %1110 = vmatmul.mubr.msk.f32.gmra.mrb[30].mxu1 %vm278_vm0, %v487_v11  ;;  %v705_v11 = vld [vmem:[%s1568_s3] sm:$0xff] }
 0x1c7   : > { %v1090_v18 = vpop.f32.mrb[16].mxu1 }
 0x1c8   : > { %v616_v19 = vadd.f32 %v1090_v18, %v953_v17  ;;  %v610_v20 = vpop.f32.mrb[17].mxu1 }
 0x1c9   : > { %v611_v21 = vadd.f32 %v953_v17, %v610_v20 }
 0x1ca   : > { %v690_v22 = vmax.f32 %v616_v19, 0.0 }
 0x1cb   : > { %v689_v23 = vmax.f32 %v611_v21, 0.0  ;;  %v1093_v24 = vpop.f32.mrb[18].mxu1 }
 0x1cc   : > { %v626_v25 = vadd.f32 %v1093_v24, %v953_v17  ;;  %v620_v26 = vpop.f32.mrb[19].mxu1 }
 0x1cd   : > { %v1164_v28 = vpack.c.bf16 %v690_v22, %v689_v23  ;;  %v621_v29 = vadd.f32 %v953_v17, %v620_v26  ;;  %v833_v22 = vlaneseq }
 0x1ce   : > { %v692_v30 = vmax.f32 %v626_v25, 0.0 }
 0x1cf   : > { %v691_v31 = vmax.f32 %v621_v29, 0.0  ;;  %1166 = vmatpush3.bf16.xpose.msk.msra.mxu0 %vm1487_vm2, %v1164_v28  ;;  %v1096_v32 = vpop.f32.mrb[20].mxu1  ;;  %v834_v25 = vshrl.u32 %v833_v22, 7 }
 0x1d0   : > { %v636_v33 = vadd.f32 %v1096_v32, %v953_v17  ;;  %v630_v34 = vpop.f32.mrb[21].mxu1  ;;  %1167 = vmatprep.subr.bf16.mxu0 %v1309_v13 }
 0x1d1   : > { %v1168_v35 = vpack.c.bf16 %v692_v30, %v691_v31  ;;  %v631_v36 = vadd.f32 %v953_v17, %v630_v34  ;;  %vm851_vm4 = vcmp.lt.s32.totalorder %v834_v25, 4 }
 0x1d2   : > { %v694_v37 = vmax.f32 %v636_v33, 0.0 }
 0x1d3   : > { %v693_v38 = vmax.f32 %v631_v36, 0.0  ;;  %v1099_v39 = vpop.f32.mrb[22].mxu1 }
 0x1d4   : > { %v646_v40 = vadd.f32 %v1099_v39, %v953_v17  ;;  %v640_v41 = vpop.f32.mrb[23].mxu1 }
 0x1d5   : > { %v1172_v42 = vpack.c.bf16 %v694_v37, %v693_v38  ;;  %v641_v43 = vadd.f32 %v953_v17, %v640_v41 }
 0x1d6   : > { %v696_v44 = vmax.f32 %v646_v40, 0.0 }
 0x1d7   : > { %1170 = vmatpush3.bf16.xpose.msk.msra.mxu0 %vm1487_vm2, %v1168_v35  ;;  %v695_v45 = vmax.f32 %v641_v43, 0.0  ;;  %v1102_v46 = vpop.f32.mrb[24].mxu1 }
 0x1d8   : > { %1171 = vmatprep.subr.bf16.mxu0 %v1309_v13  ;;  %v656_v47 = vadd.f32 %v1102_v46, %v953_v17  ;;  %v650_v48 = vpop.f32.mrb[25].mxu1 }
 0x1d9   : > { %v1176_v49 = vpack.c.bf16 %v696_v44, %v695_v45  ;;  %v651_v50 = vadd.f32 %v953_v17, %v650_v48 }
 0x1da   : > { %v698_v51 = vmax.f32 %v656_v47, 0.0 }
 0x1db   : > { %v697_v52 = vmax.f32 %v651_v50, 0.0  ;;  %v1105_v53 = vpop.f32.mrb[26].mxu1 }
 0x1dc   : > { %v666_v54 = vadd.f32 %v1105_v53, %v953_v17  ;;  %v660_v55 = vpop.f32.mrb[27].mxu1 }
 0x1dd   : > { %v1180_v56 = vpack.c.bf16 %v698_v51, %v697_v52  ;;  %v661_v57 = vadd.f32 %v953_v17, %v660_v55 }
 0x1de   : > { %v700_v58 = vmax.f32 %v666_v54, 0.0 }
 0x1df   : > { %1174 = vmatpush3.bf16.xpose.msk.msra.mxu0 %vm1487_vm2, %v1172_v42  ;;  %v699_v59 = vmax.f32 %v661_v57, 0.0  ;;  %v1108_v60 = vpop.f32.mrb[28].mxu1 }
 0x1e0   : > { %1175 = vmatprep.subr.bf16.mxu0 %v1309_v13  ;;  %v676_v61 = vadd.f32 %v1108_v60, %v953_v17  ;;  %v670_v62 = vpop.f32.mrb[29].mxu1 }
 0x1e1   : > { %v1184_v63 = vpack.c.bf16 %v700_v58, %v699_v59  ;;  %v671_v0 = vadd.f32 %v953_v17, %v670_v62 }
 0x1e2   : > { %v702_v1 = vmax.f32 %v676_v61, 0.0 }
 0x1e3   : > { %v701_v2 = vmax.f32 %v671_v0, 0.0  ;;  %v1111_v3 = vpop.f32.mrb[30].mxu1 }
 0x1e4   : > { %v686_v4 = vadd.f32 %v1111_v3, %v953_v17  ;;  %v680_v5 = vpop.f32.mrb[31].mxu1 }
 0x1e5   : > { %v1188_v6 = vpack.c.bf16 %v702_v1, %v701_v2  ;;  %v681_v7 = vadd.f32 %v953_v17, %v680_v5 }
 0x1e6   : > { %v704_v8 = vmax.f32 %v686_v4, 0.0 }
 0x1e7   : > { %1178 = vmatpush3.bf16.xpose.msk.msra.mxu0 %vm1487_vm2, %v1176_v49  ;;  %v703_v9 = vmax.f32 %v681_v7, 0.0 }
 0x1e8   : > { %1179 = vmatprep.subr.bf16.mxu0 %v1309_v13 }
 0x1e9   : > { %v1192_v10 = vpack.c.bf16 %v704_v8, %v703_v9 }
 0x1ef   : > { %1182 = vmatpush3.bf16.xpose.msk.msra.mxu0 %vm1487_vm2, %v1180_v56 }
 0x1f0   : > { %1183 = vmatprep.subr.bf16.mxu0 %v1309_v13 }
 0x1f7   : > { %1186 = vmatpush3.bf16.xpose.msk.msra.mxu0 %vm1487_vm2, %v1184_v63 }
 0x1f8   : > { %1187 = vmatprep.subr.bf16.mxu0 %v1309_v13 }
 0x1ff   : > { %1190 = vmatpush3.bf16.xpose.msk.msra.mxu0 %vm1487_vm2, %v1188_v6 }
 0x200   : > { %1191 = vmatprep.subr.bf16.mxu0 %v1309_v13 }
 0x207   : > { %1194 = vmatpush3.bf16.xpose.msk.msra.mxu0 %vm1487_vm2, %v1192_v10 }
 0x20e   : > { %1145 = vmatmul.mubr.msk.f32.vlgmr.msra.gmra.mrb[0].mxu0 %vm278_vm0, %v705_v11 }
 0x2e1   : > { %v829_v14 = vpop.f32.mrb[0].mxu0 }
 0x2e2   : > { %v830_v15 = vadd.f32 %v829_v14, %v710_v12  ;;  %v1146_v16 = vpop.f32.mrb[1].mxu0 }
 0x2e4   : > { %v837_v17 = vand.u32 2147483647, %v830_v15  ;;  %v836_v29 = vmax.f32 %v830_v15, 0.0 }
 0x2e6   : > { %v838_v18 = vsub.f32 0.0, %v837_v17 }
 0x2e8   : > { %v839_v19 = vmul.f32 1.442695, %v838_v18 }
 0x2ea   : > { %1239 = vpow2.f32 %v839_v19 }
 0x2f4   : > { %v1240_v20 = vpop.eup %1239 }
 0x2f5   : > { %v841_v13 = vadd.f32 1.0, %v1240_v20  ;;  %v844_v21 = vmul.f32 -0.5, %v1240_v20  ;;  %v847_v24 = vand.u32 2147483647, %v1240_v20 }
 0x2f7   : > { %1241 = vlog2.f32 %v841_v13  ;;  %v845_v23 = vadd.f32 1.0, %v844_v21  ;;  %vm848_vm3 = vcmp.lt.f32.partialorder %v847_v24, 0.0004427343 }
 0x2f8   : > { %1243 = vtanh.f32 %v830_v15 }
 0x2f9   : > { %v846_v28 = vmul.f32 %v1240_v20, %v845_v23 }
 0x301   : > { %v1242_v26 = vpop.eup %1241 }
 0x302   : > { %v843_v27 = vmul.f32 0.6931472, %v1242_v26  ;;  %v1244_v32 = vpop.eup %1243 }
 0x304   : > { %v849_v30 = vsel %vm848_vm3, %v846_v28, %v843_v27 }
 0x305   : > { %v850_v31 = vadd.f32 %v849_v30, %v836_v29 }
 0x307   : > { %v854_v33 = vsel %vm851_vm4, %v1244_v32, %v850_v31 }
 0x308   : > { %855 = vst [vmem:[%s245_s11] sm:$0xff] %v854_v33 }
 0x309   : > { %1258 = shalt.err (!%p1255_p3)
}
 0x30a   : > { %s1259_s20 = scalar_lea.hbm %s1523_s15, 128  ;;  %s1263_s29 = scalar_lea.hbm %s1571_s6, 512 }
 0x30b   : > { %p1260_p4 = scmp.ne.s32.totalorder %s1523_s15, %s1259_s20  ;;  %p1264_p9 = scmp.lt.u32.totalorder %s1523_s15, %s1571_s6 }
 0x30c   : > { %p1265_p10 = scmp.lt.u32.totalorder %s1263_s29, %s1259_s20  ;;  %p1267_p12 = scmp.lt.u32.totalorder %s1259_s20, %s1523_s15 }
 0x30d   : > { %p1261_p7 = pnand %p1260_p4, %p1387_p5 }
 0x30e   : > { %p1266_p11 = por %p1265_p10, %p1264_p9 }
 0x30f   : > { %p1262_p8 = pneg %p1261_p7 }
 0x310   : > { %p1268_p13 = por %p1267_p12, %p1266_p11 }
 0x312   : > { %p1269_p0 = pnand %p1268_p13, %p1262_p8 }
 0x314   : > { %1272 = shalt.err (!%p1269_p0)
}
 0x315   : > { %1195 = dma.vmem_to_hbm [thread:$0]  (%p1387_p5), %s1525_s12, 128, %s1523_s15, %s857_s16  }
 0x316 PF: > { %p1201_p1 = scmp.ge.s32.totalorder %s1307_s24, 2  ;;  %s882_s11 = sand.u32 1, %s1295_s21  }
 0x317   : > { %s883_s13 = scalar_lea.sflag [#allocation3], %s882_s11 }
 0x318   : > { %p1198_p2 = pnand %p1201_p1, %p1391_p6 }
 0x31a   : > { %1290 = dma.done.wait (!%p1198_p2), %s883_s13, 128  }
 0x31b   : > { %1292 = vsyncadd (!%p1198_p2), %s883_s13, 4294967168  ;;  %p16_p3 = scmp.ge.s32.totalorder %s1374_s27, 6   ;;  %s1576_s21 = smov %s1299_s22 }
 0x31c   : > { %s1577_s22 = smov %s1303_s23  ;;  %s1578_s23 = smov %s1385_s30 }
 0x31d   : > { %s1579_s24 = smov %s1374_s27  ;;  %18 = sbr.rel (!%p16_p3) target bundleno = 3 (0x3), region = 79 }
 0x324   :  { %888 = vsyncpa [#allocation3], 1 }
 0x325   :  { %890 = vsyncpa [#allocation3 + $0x1], 1 }

</bundles_post_ra>
